<compile_context>
chip_gen: v5e
topology: v5e:2x2
jax: 0.10.0
libtpu: 0.0.40
codegen_flags: <defaults>
</compile_context>

<pallas_src>
import functools

import jax
import jax.numpy as jnp
from jax.experimental import pallas as pl
from jax.experimental.pallas import tpu as pltpu

_LANES = 128
_SUBLANES = 8
_TILE = _SUBLANES * _LANES          # 1024 elements = one f32 (8,128) tile
_MAX_BLOCK_ROWS = 2048              # 2048 * 128 * 4B = 1 MiB per input per step
_SPLIT = 2                          # partial accumulators (uses both TCs on v7x)


def _cdiv(a, b):
    return -(-a // b)


def _mae_kernel(x_ref, y_ref, acc_ref, *, n_valid_rows, block_rows, needs_mask):
    """Fold one (block_rows, 128) tile of |x - y| into an (8, 128) accumulator.

    acc_ref is this core's output block; its index_map ignores the inner grid
    axis, so it stays resident in VMEM across the whole reduction.
    """
    i = pl.program_id(1)

    @pl.when(i == 0)
    def _init():
        acc_ref[...] = jnp.zeros_like(acc_ref)

    diff = jnp.abs(x_ref[...].astype(jnp.float32) - y_ref[...].astype(jnp.float32))

    if needs_mask:  # static: only emitted when the grid over-covers the data
        g = pl.program_id(0) * pl.num_programs(1) + i       # global block index
        row = jax.lax.broadcasted_iota(jnp.int32, diff.shape, 0)
        diff = jnp.where(g * block_rows + row < n_valid_rows, diff, 0.0)

    # Fold (block_rows, 128) -> (8, 128): tile-aligned reshape + pure VPU adds.
    acc_ref[...] += jnp.sum(diff.reshape(-1, _SUBLANES, _LANES), axis=0)


def custom_mae_loss(inputs, targets, reduction="mean"):
    """Pallas equivalent of CustomMAELoss.forward (returns a 0-d f32 scalar)."""
    assert reduction in ("mean", "sum")
    x = jnp.reshape(inputs, (-1,))
    y = jnp.reshape(targets, (-1,))
    n = x.shape[0]

    # Align to one (8, 128) tile.  Skipped entirely when n is already a
    # multiple of 1024 (the common case); otherwise pads at most 1023 zeros,
    # which contribute |0 - 0| = 0.  We never pad to block granularity --
    # the tail block is masked inside the kernel instead.
    pad = (-n) % _TILE
    if pad:
        x = jnp.pad(x, (0, pad))
        y = jnp.pad(y, (0, pad))
    rows = (n + pad) // _LANES                       # multiple of 8 (and of 16)

    block_rows = min(_MAX_BLOCK_ROWS, rows)          # full dim or multiple of 8
    num_blocks = _cdiv(rows, block_rows)
    split = min(_SPLIT, num_blocks)
    inner = _cdiv(num_blocks, split)

    # Mask whenever the (split * inner) grid over-covers `rows` (partial tail
    # block and/or duplicated blocks assigned to the second core).
    needs_mask = split * inner * block_rows != rows
    oversubscribed = split * inner > num_blocks

    if oversubscribed:
        # Clamp duplicated trailing blocks onto the last real block; their
        # contribution is fully masked out inside the kernel.
        def in_map(o, i):
            return (jnp.minimum(o * inner + i, num_blocks - 1), 0)
    else:
        def in_map(o, i):
            return (o * inner + i, 0)

    x2 = x.reshape(rows, _LANES)
    y2 = y.reshape(rows, _LANES)

    kernel = functools.partial(
        _mae_kernel,
        n_valid_rows=rows,
        block_rows=block_rows,
        needs_mask=needs_mask,
    )

    partials = pl.pallas_call(
        kernel,
        out_shape=jax.ShapeDtypeStruct((split * _SUBLANES, _LANES), jnp.float32),
        grid_spec=pltpu.PrefetchScalarGridSpec(
            num_scalar_prefetch=0,
            grid=(split, inner),
            in_specs=[
                pl.BlockSpec((block_rows, _LANES), in_map),
                pl.BlockSpec((block_rows, _LANES), in_map),
            ],
            out_specs=pl.BlockSpec((_SUBLANES, _LANES), lambda o, i: (o, 0)),
        ),
        compiler_params=pltpu.CompilerParams(
            dimension_semantics=("parallel", "arbitrary"),
        ),
    )(x2, y2)

    total = jnp.sum(partials)        # tiny (split * 1024 element) final reduce
    if reduction == "mean":
        total = total / jnp.float32(n)
    return total


if __name__ == "__main__":
    key = jax.random.PRNGKey(0)

    def ref_loss(a, b, reduction):
        d = jnp.abs(a.reshape(-1).astype(jnp.float32) - b.reshape(-1).astype(jnp.float32))
        return jnp.mean(d) if reduction == "mean" else jnp.sum(d)

    # Small NCHW prediction/target pair, like the PyTorch module sees.
    k1, k2 = jax.random.split(key)
    shape = (2, 4, 16, 16)
    inputs = jax.random.normal(k1, shape, dtype=jnp.float32)
    targets = jax.random.normal(k2, shape, dtype=jnp.float32)

    loss_mean = custom_mae_loss(inputs, targets, reduction="mean")
    loss_sum = custom_mae_loss(inputs, targets, reduction="sum")
    jax.block_until_ready((loss_mean, loss_sum))
    assert jnp.allclose(loss_mean, ref_loss(inputs, targets, "mean"), rtol=1e-5, atol=1e-5)
    assert jnp.allclose(loss_sum, ref_loss(inputs, targets, "sum"), rtol=1e-5, atol=1e-3)

    # Unaligned element count -> exercises the single-tile pad path.
    k3, k4 = jax.random.split(k2)
    a = jax.random.normal(k3, (3, 5, 7, 11), dtype=jnp.float32)
    b = jax.random.normal(k4, (3, 5, 7, 11), dtype=jnp.float32)
    loss_u = custom_mae_loss(a, b, reduction="mean")
    jax.block_until_ready(loss_u)
    assert jnp.allclose(loss_u, ref_loss(a, b, "mean"), rtol=1e-5, atol=1e-5)

    # Multi-block case -> exercises the 2-way core split, the clamped index
    # map, and the in-kernel tail masking.
    k5, k6 = jax.random.split(k4)
    c = jax.random.normal(k5, (2, 3, 300, 300), dtype=jnp.float32)
    d = jax.random.normal(k6, (2, 3, 300, 300), dtype=jnp.float32)
    loss_m = custom_mae_loss(c, d, reduction="sum")
    jax.block_until_ready(loss_m)
    assert jnp.allclose(loss_m, ref_loss(c, d, "sum"), rtol=1e-4, atol=1e-2)

    print("KERNEL_OK")
</pallas_src>

<mosaic_0001>
module attributes {stable_mosaic.version = 11 : i64} {
  func.func @_mae_kernel(%arg0: i32, %arg1: i32, %arg2: memref<16x128xf32, #tpu.memory_space<vmem>>, %arg3: memref<16x128xf32, #tpu.memory_space<vmem>>, %arg4: memref<8x128xf32, #tpu.memory_space<vmem>>) attributes {dimension_semantics = [#tpu.dimension_semantics<parallel>, #tpu.dimension_semantics<arbitrary>], iteration_bounds = array<i64: 1, 1>, scalar_prefetch = 0 : i64, scratch_operands = 0 : i64, tpu.core_type = #tpu.core_type<tc>, window_params = [{transform_indices = @transform_0, window_bounds = array<i64: 16, 128>}, {transform_indices = @transform_1, window_bounds = array<i64: 16, 128>}, {transform_indices = @transform_2, window_bounds = array<i64: 8, 128>}]} {
    %c0_i32 = arith.constant 0 : i32
    %0 = arith.cmpi eq, %arg1, %c0_i32 : i32
    %1 = arith.extui %0 : i1 to i32
    %c0_i32_0 = arith.constant 0 : i32
    %2 = arith.cmpi ne, %1, %c0_i32_0 : i32
    scf.if %2 {
      %cst_8 = arith.constant 0.000000e+00 : f32
      %12 = vector.broadcast %cst_8 : f32 to vector<8x128xf32>
      %c0_9 = arith.constant 0 : index
      %c0_10 = arith.constant 0 : index
      %13 = vector.load %arg4[%c0_9, %c0_10] : memref<8x128xf32, #tpu.memory_space<vmem>>, vector<8x128xf32>
      tpu.vector_store %arg4[%c0_9, %c0_10], %12 {strides = array<i32>} : memref<8x128xf32, #tpu.memory_space<vmem>>, vector<8x128xf32>,
    } else {
    }
    %c0 = arith.constant 0 : index
    %c0_1 = arith.constant 0 : index
    %3 = vector.load %arg2[%c0, %c0_1] : memref<16x128xf32, #tpu.memory_space<vmem>>, vector<16x128xf32>
    %c0_2 = arith.constant 0 : index
    %c0_3 = arith.constant 0 : index
    %4 = vector.load %arg3[%c0_2, %c0_3] : memref<16x128xf32, #tpu.memory_space<vmem>>, vector<16x128xf32>
    %5 = arith.subf %3, %4 : vector<16x128xf32>
    %6 = math.absf %5 : vector<16x128xf32>
    %c0_4 = arith.constant 0 : index
    %c0_5 = arith.constant 0 : index
    %7 = vector.load %arg4[%c0_4, %c0_5] : memref<8x128xf32, #tpu.memory_space<vmem>>, vector<8x128xf32>
    %8 = vector.shape_cast %6 : vector<16x128xf32> to vector<2x8x128xf32>
    %cst = arith.constant dense<0.000000e+00> : vector<8x128xf32>
    %9 = vector.multi_reduction <add>, %8, %cst [0] : vector<2x8x128xf32> to vector<8x128xf32>
    %10 = arith.addf %7, %9 : vector<8x128xf32>
    %c0_6 = arith.constant 0 : index
    %c0_7 = arith.constant 0 : index
    %11 = vector.load %arg4[%c0_6, %c0_7] : memref<8x128xf32, #tpu.memory_space<vmem>>, vector<8x128xf32>
    tpu.vector_store %arg4[%c0_6, %c0_7], %10 {strides = array<i32>} : memref<8x128xf32, #tpu.memory_space<vmem>>, vector<8x128xf32>,
    return
  }
  func.func @transform_0(%arg0: i32, %arg1: i32) -> (i32, i32) {
    %c1_i32 = arith.constant 1 : i32
    %0 = arith.muli %arg0, %c1_i32 : i32
    %1 = arith.addi %0, %arg1 : i32
    %c0_i32 = arith.constant 0 : i32
    %c0_i32_0 = arith.constant 0 : i32
    return %1, %c0_i32 : i32, i32
  }
  func.func @transform_1(%arg0: i32, %arg1: i32) -> (i32, i32) {
    %c1_i32 = arith.constant 1 : i32
    %0 = arith.muli %arg0, %c1_i32 : i32
    %1 = arith.addi %0, %arg1 : i32
    %c0_i32 = arith.constant 0 : i32
    %c0_i32_0 = arith.constant 0 : i32
    return %1, %c0_i32 : i32, i32
  }
  func.func @transform_2(%arg0: i32, %arg1: i32) -> (i32, i32) {
    %c0_i32 = arith.constant 0 : i32
    %c0_i32_0 = arith.constant 0 : i32
    return %arg0, %c0_i32 : i32, i32
  }
}

</mosaic_0001>

<bundles_post_ra>
// kernel: tpu_custom_call.1
= control target key start
LH: loop header
LB: loop body
LE: loop exit
PB: predicated region body
PF: predicated region fallthrough
CT: control target
= control target key end

     0   :  { %7 = vsyncpa [#allocation3], 0  ;;  %s204_s0 = inlined_call_operand.hbm [shape: f32[16,128], index: 0, kind: input, shape index: {}]   ;;  %s205_s1 = inlined_call_operand.hbm [shape: f32[16,128], index: 1, kind: input, shape index: {}]   ;;  %s206_s2 = inlined_call_operand.hbm [shape: f32[8,128], index: 2, kind: output, shape index: {}]  }
   0x1   :  { %8 = vsyncpa [#allocation6], 0 }
   0x2   :  { %9 = vsyncpa [#allocation4], 0  ;;  %s18_s11 = sshll.u32 %s204_s0, 4  ;;  %s175_s12 = smov [#allocation2]   ;;  %s19_s11 = int_to_ptr.hbm [resolvable:$true] %s18_s11 }
   0x3   :  { %s20_s13 = sshll.u32 %s175_s12, 4  ;;  %s35_s16 = sshll.u32 %s205_s1, 4  ;;  %s21_s13 = int_to_ptr.vmem [resolvable:$true] %s20_s13  ;;  %s36_s16 = int_to_ptr.hbm [resolvable:$true] %s35_s16 }
   0x4   :  { %s176_s17 = smov 128   ;;  %s177_s18 = smov 8  }
   0x5   :  { %26 = dma.hbm_to_vmem [thread:$0]  %s19_s11, 256, %s21_s13, [#allocation3], %s176_s17, %s176_s17, %s177_s18  }
   0x6   :  { %s178_s19 = smov [#allocation5]  }
   0x7   :  { %s37_s20 = sshll.u32 %s178_s19, 4  ;;  %s38_s20 = int_to_ptr.vmem [resolvable:$true] %s37_s20 }
   0x8   :  { %43 = dma.hbm_to_vmem [thread:$0]  %s36_s16, 256, %s38_s20, [#allocation6], %s176_s17, %s176_s17, %s177_s18  }
   0x9   :  { %169 = dma.done.wait [#allocation3], 256  }
   0xa   :  { %170 = vsyncadd [#allocation3], 4294967040 }
   0xb   :  { %171 = dma.done.wait [#allocation6], 256  }
   0xc   :  { %172 = vsyncadd [#allocation6], 4294967040  ;;  %v61_v0 = vld [vmem:[#allocation2] sm:$0xff]  ;;  %v62_v1 = vld [vmem:[#allocation2 + $0x8] sm:$0xff]  ;;  %s179_s0 = smov [#allocation7]   ;;  %s80_s23 = sshll.u32 %s206_s2, 4  ;;  %s81_s23 = int_to_ptr.hbm [resolvable:$true] %s80_s23 }
   0xd   :  { %v63_v2 = vld [vmem:[#allocation5] sm:$0xff]  ;;  %v64_v3 = vld [vmem:[#allocation5 + $0x8] sm:$0xff]  ;;  %s78_s1 = sshll.u32 %s179_s0, 4  ;;  %s79_s1 = int_to_ptr.vmem [resolvable:$true] %s78_s1 }
   0xe   :  { %v65_v4 = vsub.f32 %v61_v0, %v63_v2  ;;  %v66_v5 = vsub.f32 %v62_v1, %v64_v3 }
  0x10   :  { %v67_v6 = vand.u32 2147483647, %v65_v4  ;;  %v68_v7 = vand.u32 2147483647, %v66_v5 }
  0x12   :  { %v70_v8 = vadd.f32 %v68_v7, %v67_v6 }
  0x14   :  { %72 = vst [vmem:[#allocation7] sm:$0xff] %v70_v8 }
  0x15   :  { %83 = dma.vmem_to_hbm [thread:$0]  %s79_s1, 128, %s81_s23, [#allocation4]  }
  0x16   :  { %173 = dma.done.wait [#allocation4], 128  }
  0x17   :  { %174 = vsyncadd [#allocation4], 4294967168 }
  0x18   :  { %88 = vsyncpa [#allocation3], 1 }
  0x19   :  { %89 = vsyncpa [#allocation6], 1 }
  0x1a   :  { %90 = vsyncpa [#allocation4], 1 }

</bundles_post_ra>
